<compile_context>
chip_gen: v7x
topology: tpu7x:2x2x1
jax: 0.10.0
libtpu: 0.0.40
codegen_flags: <defaults>
</compile_context>

<pallas_src>
import jax
import jax.numpy as jnp
from jax.experimental import pallas as pl
from jax.experimental.pallas import tpu as pltpu

D = 32          # head_dim / feature dim
N_QUERIES = 8
N_KEYS = 4
N_VALUES = 4
N_OUT = N_QUERIES * D            # 256 output lanes per batch row

_TB_MAX = 8192                   # batch tile (multiple of 8); ~18 MiB dbl-buffered
_VMEM_LIMIT = 40 * 1024 * 1024   # explicit scoped-VMEM limit (fits all gens)


def _round_up(x, m):
    return ((x + m - 1) // m) * m


def fused_kernel(x_ref, w_ref, b_ref, o_ref):
    # x: (TB, 32)  w: (32, 256)  b: (1, 256)  o: (TB, 256)
    o_ref[...] = (
        jnp.dot(x_ref[...], w_ref[...], preferred_element_type=jnp.float32)
        + b_ref[...]
    )


def model_forward(x1, x2, wqkv, bqkv, wout, bout):
    # x2 is accepted but unused, matching the torch module's forward signature.
    del x2
    B = x1.shape[0]

    # Exact weight fusion (one-time, tiny, highest precision):
    #   (x @ Wv + bv) @ Wout + bout  ==  x @ (Wv @ Wout) + (bv @ Wout + bout)
    w_v = wqkv[:, 2 * D:3 * D]                                   # (32, 32)
    b_v = bqkv[:, 2 * D:3 * D]                                   # (1, 32)
    w_small = jnp.dot(w_v, wout, precision=jax.lax.Precision.HIGHEST)
    b_small = jnp.dot(b_v, wout, precision=jax.lax.Precision.HIGHEST) + bout
    # Fuse the n_queries replication: tile 8x along N -> lane-dense 256 output.
    w_fused = jnp.tile(w_small, (1, N_QUERIES)).astype(jnp.float32)  # (32, 256)
    b_fused = jnp.tile(b_small, (1, N_QUERIES)).astype(jnp.float32)  # (1, 256)

    # Large batch tile; partial last block handled by Pallas (no pad copy).
    tb = min(_TB_MAX, _round_up(B, 8))
    grid = pl.cdiv(B, tb)

    bytes_accessed = (B * D * 4) + (B * N_OUT * 4) + (D * N_OUT * 4) + (N_OUT * 4)
    flops = 2 * B * D * N_OUT

    out = pl.pallas_call(
        fused_kernel,
        out_shape=jax.ShapeDtypeStruct((B, N_OUT), jnp.float32),
        grid_spec=pltpu.PrefetchScalarGridSpec(
            num_scalar_prefetch=0,
            grid=(grid,),
            in_specs=[
                pl.BlockSpec((tb, D), lambda i: (i, 0)),       # x tile
                pl.BlockSpec((D, N_OUT), lambda i: (0, 0)),    # fused weight
                pl.BlockSpec((1, N_OUT), lambda i: (0, 0)),    # fused bias
            ],
            out_specs=pl.BlockSpec((tb, N_OUT), lambda i: (i, 0)),
        ),
        compiler_params=pltpu.CompilerParams(
            dimension_semantics=("parallel",),
            vmem_limit_bytes=_VMEM_LIMIT),
        cost_estimate=pl.CostEstimate(
            flops=flops, transcendentals=0, bytes_accessed=bytes_accessed),
    )(x1, w_fused, b_fused)

    # Each batch row holds 8 identical 32-wide query outputs back-to-back, so
    # the torch o.flatten(0, 1) is a free contiguous reshape.
    return out.reshape(B * N_QUERIES, D)


def _reference(x1, wqkv, bqkv, wout, bout):
    # Pure-JAX full attention path (the un-collapsed math) for verification.
    qkv = jnp.dot(x1, wqkv) + bqkv
    q, k, v = qkv[:, :D], qkv[:, D:2 * D], qkv[:, 2 * D:]
    Q = jnp.repeat(q[:, None, :], N_QUERIES, axis=1)
    K = jnp.repeat(k[:, None, :], N_KEYS, axis=1)
    V = jnp.repeat(v[:, None, :], N_VALUES, axis=1)
    att = jnp.einsum('bqd,bkd->bqk', Q, K)
    scaled = att / jnp.sqrt(jnp.float32(D))
    w = jax.nn.softmax(scaled, axis=-1)
    o = jnp.einsum('bqk,bkd->bqd', w, V).reshape(-1, D)
    return jnp.dot(o, wout) + bout


if __name__ == "__main__":
    key = jax.random.PRNGKey(0)
    kx1, kx2, k1, k2, k3, k4 = jax.random.split(key, 6)

    B = 2
    # TODO(synk): the spec's x1 = torch.randn(2, 32, 3) is itself inconsistent
    # with Linear(32, 96); we use (B, 32) rows as the Linear's fan-in implies.
    x1 = jax.random.normal(kx1, (B, D), dtype=jnp.float32)
    x2 = jax.random.normal(kx2, (B, D), dtype=jnp.float32)  # unused by forward

    # Deterministic Linear-style init (U[-1/sqrt(fan_in), 1/sqrt(fan_in)]).
    bound = 1.0 / jnp.sqrt(jnp.float32(D))
    wqkv = jax.random.uniform(k1, (D, 3 * D), jnp.float32, -bound, bound)
    bqkv = jax.random.uniform(k2, (1, 3 * D), jnp.float32, -bound, bound)
    wout = jax.random.uniform(k3, (D, D), jnp.float32, -bound, bound)
    bout = jax.random.uniform(k4, (1, D), jnp.float32, -bound, bound)

    out = model_forward(x1, x2, wqkv, bqkv, wout, bout)
    out = jax.block_until_ready(out)

    assert out.shape == (B * N_QUERIES, D), out.shape
    assert bool(jnp.all(jnp.isfinite(out)))

    # The algebraic collapse must match the full attention math
    # (up to f32 rounding from the reassociated weight fusion).
    ref = _reference(x1, wqkv, bqkv, wout, bout)
    assert bool(jnp.allclose(out, ref, rtol=1e-5, atol=1e-5))

    print("KERNEL_OK")
</pallas_src>

<mosaic_0001>
module attributes {stable_mosaic.version = 11 : i64} {
  func.func @fused_kernel(%arg0: i32, %arg1: memref<8x32xf32, #tpu.memory_space<vmem>>, %arg2: memref<32x256xf32, #tpu.memory_space<vmem>>, %arg3: memref<1x256xf32, #tpu.memory_space<vmem>>, %arg4: memref<8x256xf32, #tpu.memory_space<vmem>>) attributes {dimension_semantics = [#tpu.dimension_semantics<parallel>], iteration_bounds = array<i64: 1>, scalar_prefetch = 0 : i64, scratch_operands = 0 : i64, tpu.core_type = #tpu.core_type<tc>, window_params = [{transform_indices = @transform_0, window_bounds = array<i64: 8, 32>}, {pipeline_mode = #tpu.pipeline_mode<synchronous>, transform_indices = @transform_1, window_bounds = array<i64: 32, 256>}, {pipeline_mode = #tpu.pipeline_mode<synchronous>, transform_indices = @transform_2, window_bounds = array<i64: 1, 256>}, {transform_indices = @transform_3, window_bounds = array<i64: 8, 256>}]} {
    %c0 = arith.constant 0 : index
    %c0_0 = arith.constant 0 : index
    %0 = vector.load %arg1[%c0, %c0_0] : memref<8x32xf32, #tpu.memory_space<vmem>>, vector<8x32xf32>
    %c0_1 = arith.constant 0 : index
    %c0_2 = arith.constant 0 : index
    %1 = vector.load %arg2[%c0_1, %c0_2] : memref<32x256xf32, #tpu.memory_space<vmem>>, vector<32x256xf32>
    %cst = arith.constant dense<0.000000e+00> : vector<8x256xf32>
    %2 = tpu.matmul %0, %1, %cst {dimension_numbers = #tpu.dot_dimension_numbers<[1], [0], [0], [1], [0, 0, 1, 1], [], []>} : vector<8x32xf32>, vector<32x256xf32>, vector<8x256xf32> -> vector<8x256xf32>
    %c0_3 = arith.constant 0 : index
    %c0_4 = arith.constant 0 : index
    %3 = vector.load %arg3[%c0_3, %c0_4] : memref<1x256xf32, #tpu.memory_space<vmem>>, vector<1x256xf32>
    %4 = vector.broadcast %3 : vector<1x256xf32> to vector<8x256xf32>
    %5 = arith.addf %2, %4 : vector<8x256xf32>
    %c0_5 = arith.constant 0 : index
    %c0_6 = arith.constant 0 : index
    %6 = vector.load %arg4[%c0_5, %c0_6] : memref<8x256xf32, #tpu.memory_space<vmem>>, vector<8x256xf32>
    tpu.vector_store %arg4[%c0_5, %c0_6], %5 {strides = array<i32>} : memref<8x256xf32, #tpu.memory_space<vmem>>, vector<8x256xf32>,
    return
  }
  func.func @transform_0(%arg0: i32) -> (i32, i32) {
    %c0_i32 = arith.constant 0 : i32
    %c0_i32_0 = arith.constant 0 : i32
    return %arg0, %c0_i32 : i32, i32
  }
  func.func @transform_1(%arg0: i32) -> (i32, i32) {
    %c0_i32 = arith.constant 0 : i32
    %c0_i32_0 = arith.constant 0 : i32
    %c0_i32_1 = arith.constant 0 : i32
    return %c0_i32, %c0_i32_0 : i32, i32
  }
  func.func @transform_2(%arg0: i32) -> (i32, i32) {
    %c0_i32 = arith.constant 0 : i32
    %c0_i32_0 = arith.constant 0 : i32
    %c0_i32_1 = arith.constant 0 : i32
    return %c0_i32, %c0_i32_0 : i32, i32
  }
  func.func @transform_3(%arg0: i32) -> (i32, i32) {
    %c0_i32 = arith.constant 0 : i32
    %c0_i32_0 = arith.constant 0 : i32
    return %arg0, %c0_i32 : i32, i32
  }
}

</mosaic_0001>

<bundles_post_ra>
// kernel: tpu_custom_call.1
= control target key start
LH: loop header
LB: loop body
LE: loop exit
PB: predicated region body
PF: predicated region fallthrough
CT: control target
= control target key end

     0   :  { %8 = vsyncpa [#allocation3], 0  ;;  %s349_s0 = inlined_call_operand.hbm [shape: f32[2,32], index: 0, kind: input, shape index: {}]   ;;  %s350_s1 = inlined_call_operand.hbm [shape: f32[32,256], index: 1, kind: input, shape index: {}]   ;;  %s351_s2 = inlined_call_operand.vmem [shape: f32[1,256], index: 2, kind: input, shape index: {}]   ;;  %s352_s3 = inlined_call_operand.hbm [shape: f32[2,256], index: 3, kind: output, shape index: {}]  }
   0x1   :  { %9 = vsyncpa [#allocation6], 0 }
   0x2   :  { %10 = vsyncpa [#allocation4], 0 }
   0x3   :  { %15 = vsyncadd [#allocation3], 96  ;;  %s279_s12 = smov [#allocation2]   ;;  %s207_s16 = scalar_lea.hbm %s349_s0, 32 }
   0x4   :  { %s16_s13 = sshll.u32 %s279_s12, 4  ;;  %p208_p0 = scmp.ne.s32.totalorder %s349_s0, %s207_s16  ;;  %s17_s13 = int_to_ptr.vmem [resolvable:$true] %s16_s13 }
   0x5   :  { %p211_p1 = scmp.lt.u32.totalorder %s207_s16, %s349_s0 }
   0x7   :  { %p213_p2 = pnand %p211_p1, %p208_p0 }
   0x9   :  { %216 = shalt.err (!%p213_p2)
}
   0xa   :  { %s217_s21 = scalar_lea.vmem %s17_s13, 32  ;;  %s221_s22 = scalar_lea.vmem %s17_s13, 128 }
   0xb   :  { %p218_p3 = scmp.ne.s32.totalorder %s17_s13, %s217_s21  ;;  %p222_p4 = scmp.lt.s32.totalorder %s17_s13, %s17_s13 }
   0xc   :  { %p223_p5 = scmp.lt.s32.totalorder %s221_s22, %s217_s21 }
   0xe   :  { %p224_p6 = por %p223_p5, %p222_p4 }
  0x10   :  { %p225_p7 = pnand %p224_p6, %p218_p3 }
  0x12   :  { %228 = shalt.err (!%p225_p7)
}
  0x13   :  { %s280_s23 = smov 32   ;;  %s281_s24 = smov 2  }
  0x14   :  { %22 = dma.hbm_to_vmem [thread:$0]  %s349_s0, 32, %s17_s13, [#allocation3], %s280_s23, %s280_s23, %s281_s24  }
  0x15   :  { %s282_s27 = smov [#allocation5]   ;;  %s229_s4 = scalar_lea.hbm %s350_s1, 1024 }
  0x16   :  { %s28_s28 = sshll.u32 %s282_s27, 4  ;;  %p230_p8 = scmp.ne.s32.totalorder %s350_s1, %s229_s4  ;;  %s29_s28 = int_to_ptr.vmem [resolvable:$true] %s28_s28 }
  0x17   :  { %p233_p9 = scmp.lt.u32.totalorder %s229_s4, %s350_s1 }
  0x19   :  { %p235_p10 = pnand %p233_p9, %p230_p8 }
  0x1b   :  { %238 = shalt.err (!%p235_p10)
}
  0x1c   :  { %s239_s9 = scalar_lea.vmem %s29_s28, 1024  ;;  %p244_p12 = scmp.lt.s32.totalorder %s29_s28, %s29_s28 }
  0x1d   :  { %p240_p11 = scmp.ne.s32.totalorder %s29_s28, %s239_s9  ;;  %p245_p13 = scmp.lt.s32.totalorder %s239_s9, %s239_s9 }
  0x1f   :  { %p246_p0 = por %p245_p13, %p244_p12 }
  0x21   :  { %p247_p1 = pnand %p246_p0, %p240_p11 }
  0x23   :  { %250 = shalt.err (!%p247_p1)
}
  0x24   :  { %s283_s0 = smov 256   ;;  %s284_s10 = smov 16  }
  0x25   :  { %34 = dma.hbm_to_vmem [thread:$0]  %s350_s1, 1024, %s29_s28, [#allocation6], %s283_s0, %s283_s0, %s284_s10  }
  0x26   :  { %273 = dma.done.wait [#allocation3], 128  }
  0x27   :  { %274 = vsyncadd [#allocation3], 4294967168 }
  0x28   :  { %275 = dma.done.wait [#allocation6], 1024  }
  0x29   :  { %276 = vsyncadd [#allocation6], 4294966272  ;;  %v285_v0 = vmov 0.0   ;;  %v45_v1 = vld [vmem:[#allocation5 + $0x8] sm:$0xff]  ;;  %v47_v2 = vld [vmem:[#allocation5 + $0x18] sm:$0xff]  ;;  %vm64_vm0 = vcmask 261120   ;;  %v54_v14 = vlaneseq }
  0x2a   :  { %132 = vmatprep.mubr.f32.mxu0 %v285_v0  ;;  %v44_v3 = vld [vmem:[#allocation5] sm:$0xff]  ;;  %v188_v4 = vpack.c.bf16 %v47_v2, %v45_v1  ;;  %v46_v5 = vld [vmem:[#allocation5 + $0x10] sm:$0xff]  ;;  %v49_v6 = vld [vmem:[#allocation5 + $0x28] sm:$0xff]  ;;  %v286_v19 = vmov 1983009808  }
  0x2b   :  { %v51_v7 = vld [vmem:[#allocation5 + $0x38] sm:$0xff]  ;;  %v190_v8 = vpack.c.bf16 %v46_v5, %v44_v3  ;;  %v48_v10 = vld [vmem:[#allocation5 + $0x20] sm:$0xff]  ;;  %v50_v11 = vld [vmem:[#allocation5 + $0x30] sm:$0xff]  ;;  %v55_v15 = vshrl.u32 %v54_v14, 7  ;;  %v144_v20 = vunpack.c.l.s4 %v286_v19 }
  0x2c   :  { %v192_v9 = vpack.c.bf16 %v51_v7, %v49_v6  ;;  %189 = vmatprep.subr.bf16.mxu0 %v188_v4  ;;  %v194_v12 = vpack.c.bf16 %v50_v11, %v48_v10  ;;  %v43_v13 = vld [vmem:[#allocation2] sm:$0xff] }
  0x2d   :  { %191 = vmatpush1.bf16.msra.mxu0 %v190_v8  ;;  %v56_v16 = vsub.s32 0, %v55_v15  ;;  %v52_v17 = vld [vmem:[%s351_s2] sm:$0x3]  ;;  %v60_v18 = vsub.s32 1, %v55_v15  ;;  %v145_v23 = vunpack.c.0.s8 %v144_v20 }
  0x2e   :  { %193 = vmatprep.subr.bf16.mxu0 %v192_v9 }
  0x2f   :  { %v57_v21 = vrot.slane %v52_v17, %v56_v16  ;;  %v61_v22 = vrot.slane %v52_v17, %v60_v18  ;;  %v148_v28 = vsub.s32 %v145_v23, %v55_v15 }
  0x31   :  { %195 = vmatpush1.bf16.msra.mxu0 %v194_v12 }
  0x34   :  { %185 = vmatmul.mubr.msk.f32.vlgmr.msra.gmra.mrb[0].mxu0 %vm64_vm0, %v43_v13 }
 0x107   :  { %v134_v24 = vpop.f32.mrb[0].mxu0 }
 0x108   :  { %v135_v25 = vadd.f32 %v134_v24, %v57_v21  ;;  %v136_v26 = vpop.f32.mrb[1].mxu0 }
 0x109   :  { %v137_v27 = vadd.f32 %v136_v26, %v61_v22 }
 0x10b   :  { %v141_v29 = vcombine.low %v135_v25, %v137_v27  ;;  %v142_v30 = vcombine.high %v135_v25, %v137_v27 }
 0x10d   :  { %v149_v31 = vrot.slane %v141_v29, %v148_v28  ;;  %v156_v32 = vrot.slane %v142_v30, %v148_v28  ;;  %186 = vst.sshfl [vmem:[#allocation7] sm:$0x33 pattern:$0x76325410] %v141_v29 }
 0x10e   :  { %187 = vst.sshfl [vmem:[#allocation7 + $0x8] sm:$0x33 pattern:$0x76325410] %v142_v30 }
 0x10f   :  { %v157_v33 = vcombine.high %v149_v31, %v149_v31  ;;  %v158_v34 = vcombine.high %v156_v32, %v156_v32 }
 0x111   :  { %164 = vst [vmem:[#allocation7 + $0x4] sm:$0xf] %v157_v33  ;;  %166 = vst [vmem:[#allocation7 + $0xc] sm:$0xf] %v158_v34 }
 0x112   :  { %171 = vsyncadd [#allocation4], 192  ;;  %s287_s2 = smov [#allocation7]  }
 0x113   :  { %s172_s14 = sshll.u32 %s287_s2, 4  ;;  %s173_s14 = int_to_ptr.vmem [resolvable:$true] %s172_s14 }
 0x114   :  { %s251_s15 = scalar_lea.vmem %s173_s14, 64  ;;  %s255_s16 = scalar_lea.vmem %s173_s14, 256 }
 0x115   :  { %p252_p2 = scmp.ne.s32.totalorder %s173_s14, %s251_s15  ;;  %p256_p3 = scmp.lt.s32.totalorder %s173_s14, %s173_s14 }
 0x116   :  { %p257_p4 = scmp.lt.s32.totalorder %s255_s16, %s251_s15 }
 0x118   :  { %p258_p5 = por %p257_p4, %p256_p3 }
 0x11a   :  { %p259_p6 = pnand %p258_p5, %p252_p2 }
 0x11c   :  { %262 = shalt.err (!%p259_p6)
}
 0x11d   :  { %s263_s19 = scalar_lea.hbm %s352_s3, 64 }
 0x11e   :  { %p264_p7 = scmp.ne.s32.totalorder %s352_s3, %s263_s19  ;;  %p267_p8 = scmp.lt.u32.totalorder %s263_s19, %s352_s3 }
 0x120   :  { %p269_p9 = pnand %p267_p8, %p264_p7 }
 0x122   :  { %272 = shalt.err (!%p269_p9)
}
 0x123   :  { %s288_s24 = smov 64   ;;  %s289_s25 = smov 4  }
 0x124   :  { %178 = dma.vmem_to_hbm [thread:$0]  %s173_s14, 64, %s352_s3, [#allocation4], %s288_s24, %s288_s24, %s289_s25  }
 0x125   :  { %277 = dma.done.wait [#allocation4], 256  }
 0x126   :  { %278 = vsyncadd [#allocation4], 4294967040 }
 0x127   :  { %182 = vsyncpa [#allocation3], 1 }
 0x128   :  { %183 = vsyncpa [#allocation6], 1 }
 0x129   :  { %184 = vsyncpa [#allocation4], 1 }

</bundles_post_ra>
